<compile_context>
chip_gen: v7x
topology: tpu7x:2x2x1
jax: 0.10.0
libtpu: 0.0.40
codegen_flags: <defaults>
</compile_context>

<pallas_src>
import math
import functools

import jax
import jax.numpy as jnp
from jax.experimental import pallas as pl
from jax.experimental.pallas import tpu as pltpu

_BG_RATE = 0.2                       # PredictionLoss default background_rate
_TWO_PI = 2.0 * math.pi
_C_BG = _BG_RATE / (_TWO_PI * 9.0)   # 0.2 * background normalizer (sigma=3, rho=0)
_C_FG = (0.99 - _BG_RATE) / _TWO_PI  # 0.79 * foreground normalizer


# ----------------------------- Pallas kernel ------------------------------ #
def _variety_loss_kernel(params_ref, targ_ref, out_ref, *, scale):
    """One mode x one scene-block: Gaussian NLL + time mean + running min."""
    # params_ref: [5, 1, T, B_blk]  (mu1, mu2, s1, s2, rho) for mode k
    # targ_ref:   [2, T, B_blk]     (x1, x2)   -- same block for every mode
    # out_ref:    [1, B_blk]        running min over modes (resident across k)
    k = pl.program_id(1)

    mu1 = params_ref[0, 0]
    mu2 = params_ref[1, 0]
    s1 = params_ref[2, 0]
    s2 = params_ref[3, 0]
    rho = params_ref[4, 0]
    x1 = targ_ref[0]
    x2 = targ_ref[1]

    n1 = x1 - mu1
    n2 = x2 - mu2
    s1s2 = s1 * s2
    det2 = (s1s2 * s1s2) * (1.0 - rho * rho)        # (s1*s2)^2 * (1 - rho^2)
    rs = jax.lax.rsqrt(det2)                        # 1 / (s1*s2*sqrt(1-rho^2))
    q = n1 * n1 * (s2 * s2) + n2 * n2 * (s1 * s1) - 2.0 * rho * n1 * n2 * s1s2
    g_fg = jnp.exp(-0.5 * q * (rs * rs)) * rs       # 2*pi * N(x; mu, Sigma)
    g_bg = jnp.exp((-1.0 / 18.0) * (n1 * n1 + n2 * n2))   # sigma=3, rho=0 bg
    nll = -jnp.log(0.01 + _C_BG * g_bg + _C_FG * g_fg)

    # Time mean (time on sublanes, un-padded) times loss_multiplier.
    mean_k = jnp.sum(nll, axis=0, keepdims=True) * scale   # [1, B_blk]

    @pl.when(k == 0)
    def _():
        out_ref[...] = jnp.full(out_ref.shape, jnp.inf, dtype=out_ref.dtype)

    out_ref[...] = jnp.minimum(out_ref[...], mean_k)


# ------------------------------- wrapper ----------------------------------- #
def variety_loss(inputs_list, targets, batch_split, *, pred_length,
                 loss_multiplier):
    """JAX glue: gather primary tracks, lay out time-on-sublanes / scenes-on-lanes."""
    num_modes = len(inputs_list)
    batch_size = int(batch_split.shape[0]) - 1
    prim = batch_split[:-1]                        # primary track indices

    # [K, T, B, 5] predicted Gaussian params of primary tracks (last T steps).
    preds = jnp.stack([s[-pred_length:] for s in inputs_list],
                      axis=0)[:, :, prim, :]
    targ = targets[:, prim, :]                     # [T, B, 2]

    K, T, B = num_modes, pred_length, batch_size
    b_pad = -(-B // 128) * 128
    # Lane block: largest of {512,384,256,128} dividing b_pad (>=512 helps v5e).
    b_blk = next(c for c in (512, 384, 256, 128) if b_pad % c == 0)

    # Time on sublanes (un-padded; block == full dim), scenes on lanes.
    params = jnp.transpose(preds, (3, 0, 1, 2)).astype(jnp.float32)   # [5,K,T,B]
    targ_t = jnp.transpose(targ, (2, 0, 1)).astype(jnp.float32)       # [2,T,B]
    # Pad scene lanes only; 0.5 keeps padded sigma/rho finite (those lanes are
    # dropped by the wrapper-side slice of the output anyway).
    params = jnp.pad(params, ((0, 0), (0, 0), (0, 0), (0, b_pad - B)),
                     constant_values=0.5)
    targ_t = jnp.pad(targ_t, ((0, 0), (0, 0), (0, b_pad - B)),
                     constant_values=0.5)

    kernel = functools.partial(
        _variety_loss_kernel,
        scale=float(loss_multiplier) / float(pred_length))

    # TODO(synk): optional bf16 shipping of params/targets (halves DMA bytes on
    # v5e/v6e) once the tolerance vs the f32 reference is re-validated.
    best = pl.pallas_call(
        kernel,
        out_shape=jax.ShapeDtypeStruct((1, b_pad), jnp.float32),
        grid=(b_pad // b_blk, K),
        in_specs=[
            pl.BlockSpec((5, 1, T, b_blk), lambda b, k: (0, k, 0, b)),
            pl.BlockSpec((2, T, b_blk), lambda b, k: (0, 0, b)),
        ],
        out_specs=pl.BlockSpec((1, b_blk), lambda b, k: (0, b)),
        compiler_params=pltpu.CompilerParams(
            dimension_semantics=("parallel", "arbitrary")),
    )(params, targ_t)

    # Sum the per-scene minima over the real (un-padded) scenes.
    return jnp.sum(best[0, :batch_size])


# --------------------------- pure-JAX reference ----------------------------- #
def _reference(inputs_list, targets, batch_split, *, pred_length,
               loss_multiplier):
    prim = batch_split[:-1]

    def gaussian_2d(params, xy):
        mu1, mu2, s1, s2, rho = [params[..., i] for i in range(5)]
        x1, x2 = xy[..., 0], xy[..., 1]
        n1, n2 = x1 - mu1, x2 - mu2
        s1s2 = s1 * s2
        z = (n1 / s1) ** 2 + (n2 / s2) ** 2 - 2.0 * rho * n1 * n2 / s1s2
        num = jnp.exp(-z / (2.0 * (1.0 - rho ** 2)))
        den = _TWO_PI * s1s2 * jnp.sqrt(1.0 - rho ** 2)
        return num / den

    def prediction_loss(sample, targ):    # PredictionLoss(keep_batch_dim=True)
        p = sample[:, prim, :].astype(jnp.float32)     # [T, B, 5]
        t = targ[:, prim, :].astype(jnp.float32)       # [T, B, 2]
        p_bg = p.at[..., 2].set(3.0).at[..., 3].set(3.0).at[..., 4].set(0.0)
        vals = -jnp.log(0.01 + _BG_RATE * gaussian_2d(p_bg, t)
                        + (0.99 - _BG_RATE) * gaussian_2d(p, t))
        return vals.mean(axis=0)                       # [B]

    per_mode = jnp.stack([prediction_loss(s[-pred_length:], targets)
                          * loss_multiplier for s in inputs_list])   # [K, B]
    return jnp.sum(jnp.min(per_mode, axis=0))


# --------------------------------- main ------------------------------------ #
if __name__ == "__main__":
    pred_length = 12
    num_modes = 4
    loss_multiplier = 1.0
    num_tracks = 6
    extra_steps = 2   # samples longer than pred_length; module slices the tail

    key = jax.random.PRNGKey(0)
    keys = jax.random.split(key, num_modes + 1)

    samples = []
    for i in range(num_modes):
        k1, k2 = jax.random.split(keys[i])
        mu = jax.random.normal(k1, (pred_length + extra_steps, num_tracks, 2))
        raw = jax.random.normal(k2, (pred_length + extra_steps, num_tracks, 3))
        sig = jax.nn.softplus(raw[..., :2]) + 0.1          # positive sigmas
        rho = jnp.tanh(raw[..., 2:3]) * 0.9                # |rho| < 1
        samples.append(jnp.concatenate([mu, sig, rho], axis=-1))  # [T+e, N, 5]

    targets = jax.random.normal(keys[-1], (pred_length, num_tracks, 2))
    batch_split = jnp.array([0, 2, 4, num_tracks], dtype=jnp.int32)  # batch=3

    loss = variety_loss(samples, targets, batch_split,
                        pred_length=pred_length,
                        loss_multiplier=loss_multiplier)
    jax.block_until_ready(loss)

    ref = _reference(samples, targets, batch_split,
                     pred_length=pred_length,
                     loss_multiplier=loss_multiplier)
    assert jnp.allclose(loss, ref, rtol=1e-4, atol=1e-4), (loss, ref)
    print("KERNEL_OK")
</pallas_src>

<mosaic_0001>
module attributes {stable_mosaic.version = 11 : i64} {
  func.func @_variety_loss_kernel(%arg0: i32, %arg1: i32, %arg2: memref<5x1x12x128xf32, #tpu.memory_space<vmem>>, %arg3: memref<2x12x128xf32, #tpu.memory_space<vmem>>, %arg4: memref<1x128xf32, #tpu.memory_space<vmem>>) attributes {dimension_semantics = [#tpu.dimension_semantics<parallel>, #tpu.dimension_semantics<arbitrary>], iteration_bounds = array<i64: 1, 4>, scalar_prefetch = 0 : i64, scratch_operands = 0 : i64, tpu.core_type = #tpu.core_type<tc>, window_params = [{transform_indices = @transform_0, window_bounds = array<i64: 5, 1, 12, 128>}, {transform_indices = @transform_1, window_bounds = array<i64: 2, 12, 128>}, {transform_indices = @transform_2, window_bounds = array<i64: 1, 128>}]} {
    %c0 = arith.constant 0 : index
    %c0_0 = arith.constant 0 : index
    %c0_1 = arith.constant 0 : index
    %c0_2 = arith.constant 0 : index
    %0 = vector.load %arg2[%c0, %c0_0, %c0_1, %c0_2] : memref<5x1x12x128xf32, #tpu.memory_space<vmem>>, vector<1x1x12x128xf32>
    %1 = vector.shape_cast %0 : vector<1x1x12x128xf32> to vector<12x128xf32>
    %c1 = arith.constant 1 : index
    %c0_3 = arith.constant 0 : index
    %c0_4 = arith.constant 0 : index
    %c0_5 = arith.constant 0 : index
    %2 = vector.load %arg2[%c1, %c0_3, %c0_4, %c0_5] : memref<5x1x12x128xf32, #tpu.memory_space<vmem>>, vector<1x1x12x128xf32>
    %3 = vector.shape_cast %2 : vector<1x1x12x128xf32> to vector<12x128xf32>
    %c2 = arith.constant 2 : index
    %c0_6 = arith.constant 0 : index
    %c0_7 = arith.constant 0 : index
    %c0_8 = arith.constant 0 : index
    %4 = vector.load %arg2[%c2, %c0_6, %c0_7, %c0_8] : memref<5x1x12x128xf32, #tpu.memory_space<vmem>>, vector<1x1x12x128xf32>
    %5 = vector.shape_cast %4 : vector<1x1x12x128xf32> to vector<12x128xf32>
    %c3 = arith.constant 3 : index
    %c0_9 = arith.constant 0 : index
    %c0_10 = arith.constant 0 : index
    %c0_11 = arith.constant 0 : index
    %6 = vector.load %arg2[%c3, %c0_9, %c0_10, %c0_11] : memref<5x1x12x128xf32, #tpu.memory_space<vmem>>, vector<1x1x12x128xf32>
    %7 = vector.shape_cast %6 : vector<1x1x12x128xf32> to vector<12x128xf32>
    %c4 = arith.constant 4 : index
    %c0_12 = arith.constant 0 : index
    %c0_13 = arith.constant 0 : index
    %c0_14 = arith.constant 0 : index
    %8 = vector.load %arg2[%c4, %c0_12, %c0_13, %c0_14] : memref<5x1x12x128xf32, #tpu.memory_space<vmem>>, vector<1x1x12x128xf32>
    %9 = vector.shape_cast %8 : vector<1x1x12x128xf32> to vector<12x128xf32>
    %c0_15 = arith.constant 0 : index
    %c0_16 = arith.constant 0 : index
    %c0_17 = arith.constant 0 : index
    %10 = vector.load %arg3[%c0_15, %c0_16, %c0_17] : memref<2x12x128xf32, #tpu.memory_space<vmem>>, vector<1x12x128xf32>
    %11 = vector.shape_cast %10 : vector<1x12x128xf32> to vector<12x128xf32>
    %c1_18 = arith.constant 1 : index
    %c0_19 = arith.constant 0 : index
    %c0_20 = arith.constant 0 : index
    %12 = vector.load %arg3[%c1_18, %c0_19, %c0_20] : memref<2x12x128xf32, #tpu.memory_space<vmem>>, vector<1x12x128xf32>
    %13 = vector.shape_cast %12 : vector<1x12x128xf32> to vector<12x128xf32>
    %14 = arith.subf %11, %1 : vector<12x128xf32>
    %15 = arith.subf %13, %3 : vector<12x128xf32>
    %16 = arith.mulf %5, %7 : vector<12x128xf32>
    %17 = arith.mulf %16, %16 : vector<12x128xf32>
    %18 = arith.mulf %9, %9 : vector<12x128xf32>
    %cst = arith.constant 1.000000e+00 : f32
    %19 = vector.broadcast %cst : f32 to vector<12x128xf32>
    %20 = arith.subf %19, %18 : vector<12x128xf32>
    %21 = arith.mulf %17, %20 : vector<12x128xf32>
    %22 = math.rsqrt %21 : vector<12x128xf32>
    %23 = arith.mulf %14, %14 : vector<12x128xf32>
    %24 = arith.mulf %7, %7 : vector<12x128xf32>
    %25 = arith.mulf %23, %24 : vector<12x128xf32>
    %26 = arith.mulf %15, %15 : vector<12x128xf32>
    %27 = arith.mulf %5, %5 : vector<12x128xf32>
    %28 = arith.mulf %26, %27 : vector<12x128xf32>
    %29 = arith.addf %25, %28 : vector<12x128xf32>
    %cst_21 = arith.constant 2.000000e+00 : f32
    %30 = vector.broadcast %cst_21 : f32 to vector<12x128xf32>
    %31 = arith.mulf %30, %9 : vector<12x128xf32>
    %32 = arith.mulf %31, %14 : vector<12x128xf32>
    %33 = arith.mulf %32, %15 : vector<12x128xf32>
    %34 = arith.mulf %33, %16 : vector<12x128xf32>
    %35 = arith.subf %29, %34 : vector<12x128xf32>
    %cst_22 = arith.constant -5.000000e-01 : f32
    %36 = vector.broadcast %cst_22 : f32 to vector<12x128xf32>
    %37 = arith.mulf %36, %35 : vector<12x128xf32>
    %38 = arith.mulf %22, %22 : vector<12x128xf32>
    %39 = arith.mulf %37, %38 : vector<12x128xf32>
    %40 = math.exp %39 : vector<12x128xf32>
    %41 = arith.mulf %40, %22 : vector<12x128xf32>
    %42 = arith.mulf %14, %14 : vector<12x128xf32>
    %43 = arith.mulf %15, %15 : vector<12x128xf32>
    %44 = arith.addf %42, %43 : vector<12x128xf32>
    %cst_23 = arith.constant -0.055555556 : f32
    %45 = vector.broadcast %cst_23 : f32 to vector<12x128xf32>
    %46 = arith.mulf %45, %44 : vector<12x128xf32>
    %47 = math.exp %46 : vector<12x128xf32>
    %cst_24 = arith.constant 0.00353677641 : f32
    %48 = vector.broadcast %cst_24 : f32 to vector<12x128xf32>
    %49 = arith.mulf %48, %47 : vector<12x128xf32>
    %cst_25 = arith.constant 0.00999999977 : f32
    %50 = vector.broadcast %cst_25 : f32 to vector<12x128xf32>
    %51 = arith.addf %50, %49 : vector<12x128xf32>
    %cst_26 = arith.constant 0.125732407 : f32
    %52 = vector.broadcast %cst_26 : f32 to vector<12x128xf32>
    %53 = arith.mulf %52, %41 : vector<12x128xf32>
    %54 = arith.addf %51, %53 : vector<12x128xf32>
    %55 = math.log %54 : vector<12x128xf32>
    %cst_27 = arith.constant 0.000000e+00 : f32
    %56 = vector.broadcast %cst_27 : f32 to vector<12x128xf32>
    %57 = arith.subf %56, %55 : vector<12x128xf32>
    %cst_28 = arith.constant dense<0.000000e+00> : vector<128xf32>
    %58 = vector.multi_reduction <add>, %57, %cst_28 [0] : vector<12x128xf32> to vector<128xf32>
    %59 = vector.shape_cast %58 : vector<128xf32> to vector<1x128xf32>
    %cst_29 = arith.constant 0.0833333358 : f32
    %60 = vector.broadcast %cst_29 : f32 to vector<1x128xf32>
    %61 = arith.mulf %59, %60 : vector<1x128xf32>
    %c0_i32 = arith.constant 0 : i32
    %62 = arith.cmpi eq, %arg1, %c0_i32 : i32
    %63 = arith.extui %62 : i1 to i32
    %c0_i32_30 = arith.constant 0 : i32
    %64 = arith.cmpi ne, %63, %c0_i32_30 : i32
    scf.if %64 {
      %cst_35 = arith.constant 0x7F800000 : f32
      %68 = vector.broadcast %cst_35 : f32 to vector<1x128xf32>
      %c0_36 = arith.constant 0 : index
      %c0_37 = arith.constant 0 : index
      %69 = vector.load %arg4[%c0_36, %c0_37] : memref<1x128xf32, #tpu.memory_space<vmem>>, vector<1x128xf32>
      tpu.vector_store %arg4[%c0_36, %c0_37], %68 {strides = array<i32>} : memref<1x128xf32, #tpu.memory_space<vmem>>, vector<1x128xf32>,
    } else {
    }
    %c0_31 = arith.constant 0 : index
    %c0_32 = arith.constant 0 : index
    %65 = vector.load %arg4[%c0_31, %c0_32] : memref<1x128xf32, #tpu.memory_space<vmem>>, vector<1x128xf32>
    %66 = arith.minimumf %65, %61 : vector<1x128xf32>
    %c0_33 = arith.constant 0 : index
    %c0_34 = arith.constant 0 : index
    %67 = vector.load %arg4[%c0_33, %c0_34] : memref<1x128xf32, #tpu.memory_space<vmem>>, vector<1x128xf32>
    tpu.vector_store %arg4[%c0_33, %c0_34], %66 {strides = array<i32>} : memref<1x128xf32, #tpu.memory_space<vmem>>, vector<1x128xf32>,
    return
  }
  func.func @transform_0(%arg0: i32, %arg1: i32) -> (i32, i32, i32, i32) {
    %c0_i32 = arith.constant 0 : i32
    %c0_i32_0 = arith.constant 0 : i32
    %c0_i32_1 = arith.constant 0 : i32
    return %c0_i32, %arg1, %c0_i32_0, %arg0 : i32, i32, i32, i32
  }
  func.func @transform_1(%arg0: i32, %arg1: i32) -> (i32, i32, i32) {
    %c0_i32 = arith.constant 0 : i32
    %c0_i32_0 = arith.constant 0 : i32
    %c0_i32_1 = arith.constant 0 : i32
    return %c0_i32, %c0_i32_0, %arg0 : i32, i32, i32
  }
  func.func @transform_2(%arg0: i32, %arg1: i32) -> (i32, i32) {
    %c0_i32 = arith.constant 0 : i32
    %c0_i32_0 = arith.constant 0 : i32
    return %c0_i32, %arg0 : i32, i32
  }
}

</mosaic_0001>

<bundles_post_ra>
// kernel: tpu_custom_call.1
= control target key start
LH: loop header
LB: loop body
LE: loop exit
PB: predicated region body
PF: predicated region fallthrough
CT: control target
= control target key end

     0   :  { %7 = vsyncpa [#allocation4], 0  ;;  %s607_s9 = smov 0   ;;  %s609_s10 = smov 0   ;;  %s710_s0 = inlined_call_operand.vmem [shape: f32[5,4,12,128], index: 0, kind: input, shape index: {}]   ;;  %s711_s1 = inlined_call_operand.vmem [shape: f32[2,12,128], index: 1, kind: input, shape index: {}]   ;;  %s712_s2 = inlined_call_operand.hbm [shape: f32[1,128], index: 2, kind: output, shape index: {}]  }
   0x1   :  { %s611_s11 = smov 0   ;;  %s613_s12 = smov 0  }
   0x2   :  { %s615_s13 = smov 0  }
   0x3 LB: > { %s431_s14 = sadd.s32 4294967295, %s588_s13   ;;  %s22_s15 = sadd.s32 1, %s584_s12  ;;  %s588_s13 = sphi %s615_s13, %s13_s13   ;;  %s584_s12 = sphi %s613_s12, %s717_s12   ;;  %s580_s11 = sphi %s611_s11, %s716_s11   ;;  %s576_s10 = sphi %s609_s10, %s715_s10   ;;  %s572_s9 = sphi %s607_s9, %s714_s9  }
   0x4   : > { %p23_p0 = scmp.ge.s32.totalorder %s22_s15, 4  ;;  %p41_p1 = scmp.ne.s32.totalorder %s576_s10, %s572_s9 }
   0x5   : > { %p42_p2 = scmp.eq.s32.totalorder %s588_s13, 0  ;;  %s34_s17 = sadd.s32 1, %s576_s10 }
   0x6   : > { %s719_s15 = smov (%p23_p0, %s22_s15), 0  ;;  %p434_p5 = scmp.ge.s32.totalorder %s588_s13, 4 }
   0x7   : > { %p43_p3 = por %p42_p2, %p41_p1  ;;  %s29_s16 = ssub.s32 %s584_s12, %s719_s15 }
   0x8   : > { %p32_p4 = scmp.eq.s32.totalorder %s29_s16, 0  ;;  %126 = sbr.rel (%p434_p5) target bundleno = 24 (0x18), region = 20 }
   0xa   : > { %s643_s18 = scalar_select %p32_p4, %s576_s10, %s34_s17  }
   0xf   : > { %129 = sbr.rel (!%p43_p3) target bundleno = 24 (0x18), region = 24  ;;  %s131_s19 = sand.u32 (%p43_p3), 1, %s576_s10  }
  0x10   : > { %s453_s20 = sshll.u32 (%p43_p3), %s584_s12, 4  ;;  %s454_s21 = smul.u32 (%p43_p3), 80, %s131_s19 }
  0x11   : > { %s137_s24 = scalar_lea.vmem (%p43_p3), %s710_s0, %s453_s20 }
  0x12   : > { %v183_v0 = vld [vmem:[%s137_s24] sm:$0xff] (%p43_p3)  ;;  %v185_v1 = vld [vmem:[%s137_s24 + $0x8] sm:$0xff] (%p43_p3)  ;;  %s133_s25 = scalar_lea.vmem (%p43_p3), [#allocation2], %s454_s21 }
  0x13   : > { %v187_v2 = vld [vmem:[%s137_s24 + $0x40] sm:$0xff] (%p43_p3)  ;;  %v189_v3 = vld [vmem:[%s137_s24 + $0x48] sm:$0xff] (%p43_p3)  ;;  %184 = vst [vmem:[%s133_s25] sm:$0xff] (%p43_p3), %v183_v0  ;;  %186 = vst [vmem:[%s133_s25 + $0x8] sm:$0xff] (%p43_p3), %v185_v1 }
  0x14   : > { %v191_v4 = vld [vmem:[%s137_s24 + $0x80] sm:$0xff] (%p43_p3)  ;;  %v193_v5 = vld [vmem:[%s137_s24 + $0x88] sm:$0xff] (%p43_p3)  ;;  %188 = vst [vmem:[%s133_s25 + $0x10] sm:$0xff] (%p43_p3), %v187_v2  ;;  %190 = vst [vmem:[%s133_s25 + $0x18] sm:$0xff] (%p43_p3), %v189_v3 }
  0x15   : > { %192 = vst [vmem:[%s133_s25 + $0x20] sm:$0xff] (%p43_p3), %v191_v4  ;;  %194 = vst [vmem:[%s133_s25 + $0x28] sm:$0xff] (%p43_p3), %v193_v5  ;;  %v195_v6 = vld [vmem:[%s137_s24 + $0xc0] sm:$0xff] (%p43_p3)  ;;  %v197_v7 = vld [vmem:[%s137_s24 + $0xc8] sm:$0xff] (%p43_p3) }
  0x16   : > { %v199_v8 = vld [vmem:[%s137_s24 + $0x100] sm:$0xff]  ;;  %196 = vst [vmem:[%s133_s25 + $0x30] sm:$0xff] %v195_v6  ;;  %198 = vst [vmem:[%s133_s25 + $0x38] sm:$0xff] %v197_v7  ;;  %v201_v9 = vld [vmem:[%s137_s24 + $0x108] sm:$0xff] }
  0x17   : > { %200 = vst [vmem:[%s133_s25 + $0x40] sm:$0xff] %v199_v8  ;;  %202 = vst [vmem:[%s133_s25 + $0x48] sm:$0xff] %v201_v9 }
  0x18 PF: > { %p437_p6 = scmp.ge.s32.totalorder %s588_s13, 1  ;;  %p207_p7 = scmp.lt.s32.totalorder %s588_s13, 5 }
  0x1a   : > { %p208_p8 = pnand %p437_p6, %p207_p7 }
  0x1b   : > { %s214_s26 = sand.u32 (!%p208_p8), 1, %s572_s9   ;;  %v252_v10 = vld [vmem:[%s711_s1] sm:$0xff] (!%p208_p8)  ;;  %v253_v11 = vld [vmem:[%s711_s1 + $0x8] sm:$0xf] (!%p208_p8)  ;;  %v446_v12 = vld [vmem:[%s711_s1 + $0x10] sm:$0xff] (!%p208_p8)  ;;  %vm331_vm0 = vcmask (!%p208_p8), 1043456  }
  0x1c   : > { %211 = sbr.rel (%p208_p8) target bundleno = 132 (0x84), region = 62  ;;  %v447_v13 = vld [vmem:[%s711_s1 + $0x18] sm:$0xf] (!%p208_p8)  ;;  %p448_p9 = scmp.ne.s32.totalorder (!%p208_p8), %s580_s11, 0 }
  0x1d   : > { %s455_s27 = smul.u32 (!%p208_p8), 80, %s214_s26 }
  0x1f   : > { %s216_s8 = scalar_lea.vmem (!%p208_p8), [#allocation2], %s455_s27 }
  0x20   : > { %v238_v14 = vld [vmem:[%s216_s8] sm:$0xff] (!%p208_p8)  ;;  %v239_v15 = vld [vmem:[%s216_s8 + $0x8] sm:$0xf] (!%p208_p8)  ;;  %v438_v16 = vld [vmem:[%s216_s8 + $0x10] sm:$0xff] (!%p208_p8) }
  0x21   : > { %v439_v17 = vld [vmem:[%s216_s8 + $0x18] sm:$0xf] (!%p208_p8)  ;;  %v440_v18 = vld [vmem:[%s216_s8 + $0x20] sm:$0xff] (!%p208_p8)  ;;  %v441_v19 = vld [vmem:[%s216_s8 + $0x28] sm:$0xf] (!%p208_p8)  ;;  %v257_v20 = vsub.f32 (!%p208_p8), %v252_v10, %v238_v14  ;;  %v258_v21 = vsub.f32 (!%p208_p8), %v253_v11, %v239_v15  ;;  %v259_v22 = vsub.f32 (!%p208_p8), %v446_v12, %v438_v16 }
  0x22   : > { %v442_v23 = vld [vmem:[%s216_s8 + $0x30] sm:$0xff] (!%p208_p8)  ;;  %v443_v24 = vld [vmem:[%s216_s8 + $0x38] sm:$0xf] (!%p208_p8)  ;;  %v444_v25 = vld [vmem:[%s216_s8 + $0x40] sm:$0xff] (!%p208_p8)  ;;  %v260_v26 = vsub.f32 (!%p208_p8), %v447_v13, %v439_v17  ;;  %v281_v27 = vmul.f32 (!%p208_p8), %v440_v18, %v440_v18  ;;  %v282_v28 = vmul.f32 (!%p208_p8), %v441_v19, %v441_v19 }
  0x23   : > { %v445_v29 = vld [vmem:[%s216_s8 + $0x48] sm:$0xf]  ;;  %v261_v30 = vmul.f32 %v442_v23, %v440_v18  ;;  %v262_v31 = vmul.f32 %v443_v24, %v441_v19  ;;  %v265_v32 = vmul.f32 %v444_v25, %v444_v25  ;;  %v273_v33 = vmul.f32 %v257_v20, %v257_v20 }
  0x24   : > { %v266_v34 = vmul.f32 %v445_v29, %v445_v29  ;;  %v274_v35 = vmul.f32 %v258_v21, %v258_v21  ;;  %v275_v36 = vmul.f32 %v442_v23, %v442_v23  ;;  %v276_v37 = vmul.f32 %v443_v24, %v443_v24 }
  0x25   : > { %v263_v38 = vmul.f32 %v261_v30, %v261_v30  ;;  %v264_v39 = vmul.f32 %v262_v31, %v262_v31  ;;  %v267_v40 = vsub.f32 1.0, %v265_v32  ;;  %v279_v41 = vmul.f32 %v259_v22, %v259_v22 }
  0x26   : > { %v268_v42 = vsub.f32 1.0, %v266_v34  ;;  %v277_v43 = vmul.f32 %v275_v36, %v273_v33  ;;  %v278_v44 = vmul.f32 %v276_v37, %v274_v35  ;;  %v280_v45 = vmul.f32 %v260_v26, %v260_v26 }
  0x27   : > { %v269_v46 = vmul.f32 %v267_v40, %v263_v38  ;;  %v283_v47 = vmul.f32 %v281_v27, %v279_v41  ;;  %v287_v48 = vmul.f32 2.0, %v444_v25  ;;  %v288_v49 = vmul.f32 2.0, %v445_v29 }
  0x28   : > { %v270_v50 = vmul.f32 %v268_v42, %v264_v39  ;;  %v284_v51 = vmul.f32 %v282_v28, %v280_v45  ;;  %v309_v52 = vadd.f32 %v279_v41, %v273_v33  ;;  %v310_v55 = vadd.f32 %v280_v45, %v274_v35 }
  0x29   : > { %504 = vrsqrt.f32 %v269_v46  ;;  %v289_v53 = vmul.f32 %v287_v48, %v257_v20  ;;  %v290_v54 = vmul.f32 %v288_v49, %v258_v21  ;;  %v285_v56 = vadd.f32 %v283_v47, %v277_v43 }
  0x2a   : > { %506 = vrsqrt.f32 %v270_v50  ;;  %v286_v57 = vadd.f32 %v284_v51, %v278_v44  ;;  %v311_v60 = vmul.f32 -0.055555556, %v309_v52  ;;  %v312_v63 = vmul.f32 -0.055555556, %v310_v55 }
  0x2b   : > { %v291_v58 = vmul.f32 %v289_v53, %v259_v22  ;;  %v292_v59 = vmul.f32 %v290_v54, %v260_v26  ;;  %v590_v43 = vmov (!%p448_p9), inf  }
  0x2c   : > { %v313_v2 = vmul.f32 1.442695, %v311_v60  ;;  %v315_v3 = vmul.f32 1.442695, %v312_v63  ;;  %345 = vst [vmem:[#allocation3] sm:$0x1] (!%p448_p9), %v590_v43 }
  0x2d   : > { %v293_v61 = vmul.f32 %v291_v58, %v261_v30  ;;  %v294_v62 = vmul.f32 %v292_v59, %v262_v31 }
  0x2e   : > { %508 = vpow2.f32 %v313_v2 }
  0x2f   : > { %v295_v0 = vsub.f32 %v285_v56, %v293_v61  ;;  %v296_v1 = vsub.f32 %v286_v57, %v294_v62  ;;  %510 = vpow2.f32 %v315_v3 }
  0x31   : > { %v297_v4 = vmul.f32 -0.5, %v295_v0  ;;  %v298_v6 = vmul.f32 -0.5, %v296_v1 }
  0x33   : > { %v505_v5 = vpop.eup %504 }
  0x34   : > { %v507_v7 = vpop.eup %506  ;;  %v299_v8 = vmul.f32 %v505_v5, %v505_v5 }
  0x35   : > { %v300_v9 = vmul.f32 %v507_v7, %v507_v7 }
  0x36   : > { %v301_v10 = vmul.f32 %v299_v8, %v297_v4 }
  0x37   : > { %v302_v11 = vmul.f32 %v300_v9, %v298_v6 }
  0x38   : > { %v303_v12 = vmul.f32 1.442695, %v301_v10  ;;  %v509_v14 = vpop.eup %508 }
  0x39   : > { %v305_v13 = vmul.f32 1.442695, %v302_v11  ;;  %v511_v15 = vpop.eup %510  ;;  %v317_v16 = vmul.f32 0.0035367764, %v509_v14 }
  0x3a   : > { %512 = vpow2.f32 %v303_v12  ;;  %v318_v17 = vmul.f32 0.0035367764, %v511_v15 }
  0x3b   : > { %514 = vpow2.f32 %v305_v13  ;;  %v319_v21 = vadd.f32 0.01, %v317_v16 }
  0x3c   : > { %v320_v23 = vadd.f32 0.01, %v318_v17 }
  0x44   : > { %v513_v18 = vpop.eup %512 }
  0x45   : > { %v515_v19 = vpop.eup %514  ;;  %v307_v20 = vmul.f32 %v513_v18, %v505_v5 }
  0x46   : > { %v308_v22 = vmul.f32 %v515_v19, %v507_v7 }
  0x47   : > { %v321_v24 = vmul.f32 0.1257324, %v307_v20 }
  0x48   : > { %v322_v25 = vmul.f32 0.1257324, %v308_v22 }
  0x49   : > { %v323_v26 = vadd.f32 %v321_v24, %v319_v21 }
  0x4a   : > { %v324_v27 = vadd.f32 %v322_v25, %v320_v23 }
  0x4b   : > { %516 = vlog2.f32 %v323_v26 }
  0x4c   : > { %518 = vlog2.f32 %v324_v27 }
  0x55   : > { %v517_v28 = vpop.eup %516 }
  0x56   : > { %v519_v29 = vpop.eup %518  ;;  %v326_v30 = vmul.f32 0.6931472, %v517_v28 }
  0x57   : > { %v328_v31 = vmul.f32 0.6931472, %v519_v29 }
  0x58   : > { %v329_v32 = vsub.f32 0.0, %v326_v30 }
  0x59   : > { %v330_v33 = vsub.f32 0.0, %v328_v31 }
  0x5b   : > { %v332_v34 = vsel %vm331_vm0, %v330_v33, 0.0 }
  0x5c   : > { %v333_v35 = vadd.f32 %v332_v34, %v329_v32 }
  0x5e   : > { %v334_v36 = vrot.slane %v333_v35, 4 }
  0x60   : > { %v335_v37 = vadd.f32 %v334_v36, %v333_v35 }
  0x62   : > { %v336_v38 = vrot.slane %v335_v37, 2 }
  0x64   : > { %v337_v39 = vadd.f32 %v336_v38, %v335_v37  ;;  %344 = sbr.rel (%p448_p9) target bundleno = 107 (0x6b), region = 70 }
  0x66   : > { %v338_v40 = vrot.slane %v337_v39, 1 }
  0x68   : > { %v339_v41 = vadd.f32 %v338_v40, %v337_v39 }
  0x6a   : > { %v340_v42 = vmul.f32 0.083333336, %v339_v41 }
  0x6b PF: > { %v346_v44 = vld [vmem:[#allocation3] sm:$0x1]  ;;  %p669_p10 = scmp.eq.s32.totalorder %s431_s14, 3  ;;  %s591_s16 = smov [#allocation3]  }
  0x6c   : > { %v347_v45 = vmin.f32 %v346_v44, %v340_v42  ;;  %s358_s17 = sshll.u32 %s591_s16, 4  ;;  %s359_s17 = int_to_ptr.vmem [resolvable:$true] %s358_s17 }
  0x6d   : > { %s520_s19 = scalar_lea.vmem %s359_s17, 16  ;;  %s526_s11 = scalar_lea.vmem %s359_s17, 32 }
  0x6e   : > { %348 = vst [vmem:[#allocation3] sm:$0x1] %v347_v45  ;;  %p521_p11 = scmp.ne.s32.totalorder %s359_s17, %s520_s19  ;;  %p527_p0 = scmp.lt.s32.totalorder %s359_s17, %s359_s17 }
  0x6f   : > { %p528_p1 = scmp.lt.s32.totalorder %s526_s11, %s520_s19 }
  0x70   : > { %p522_p12 = pnand %p521_p11, %p669_p10 }
  0x71   : > { %p529_p2 = por %p528_p1, %p527_p0 }
  0x72   : > { %p523_p13 = pneg %p522_p12 }
  0x74   : > { %p530_p3 = pnand %p529_p2, %p523_p13 }
  0x76   : > { %533 = shalt.err (!%p530_p3)
}
  0x77   : > { %s534_s21 = scalar_lea.hbm %s712_s2, 16 }
  0x78   : > { %p535_p4 = scmp.ne.s32.totalorder %s712_s2, %s534_s21  ;;  %p540_p7 = scmp.lt.u32.totalorder %s534_s21, %s712_s2 }
  0x7a   : > { %p536_p5 = pnand %p535_p4, %p669_p10 }
  0x7c   : > { %p537_p6 = pneg %p536_p5 }
  0x7e   : > { %p542_p8 = pnand %p540_p7, %p537_p6 }
  0x80   : > { %545 = shalt.err (!%p542_p8)
}
  0x81   : > { %457 = dma.vmem_to_hbm [thread:$0]  (%p669_p10), %s359_s17, 16, %s712_s2, [#allocation4]  }
  0x82   : > { %567 = dma.done.wait (%p669_p10), [#allocation4], 16  }
  0x83   : > { %569 = vsyncadd (%p669_p10), [#allocation4], 4294967280 }
  0x84 PF: > { %s13_s13 = sadd.s32 1, %s588_s13   ;;  %s714_s9 = smov %s576_s10 }
  0x85   : > { %p10_p9 = scmp.ge.s32.totalorder %s13_s13, 6   ;;  %s715_s10 = smov %s643_s18 }
  0x86   : > { %s716_s11 = smov %s584_s12  ;;  %s717_s12 = smov %s719_s15 }
  0x87   :  { %12 = sbr.rel (!%p10_p9) target bundleno = 3 (0x3), region = 111 }
  0x8e   :  { %371 = vsyncpa [#allocation4], 1 }
  0x8f   :  { %373 = vsyncpa [#allocation4 + $0x1], 1 }

</bundles_post_ra>
